<compile_context>
chip_gen: v7x
topology: tpu7x:2x2x1
jax: 0.10.0
libtpu: 0.0.40
codegen_flags: <defaults>
</compile_context>

<pallas_src>
import functools
import math

import jax
import jax.numpy as jnp
from jax.experimental import pallas as pl
from jax.experimental.pallas import tpu as pltpu


def _round_up(n: int, m: int) -> int:
    return ((n + m - 1) // m) * m


def _ri_mlp_kernel(pooling, n_layers, num_offsets, x_ref, *refs):
    """x_ref: (tm, D_pad) tile.  refs = (w1s, b1, w2, b2, ..., wL, bL, o_ref).

    w1s: (O, D_pad, H1_pad) first-layer weights, pre-rolled per offset (resident).
    wl:  (H_{l-1}_pad, H_l_pad) compute dtype, bl: (1, H_l_pad) f32.
    o_ref: (tm, H_last_pad) f32 tile.
    """
    o_ref = refs[-1]
    wb = refs[:-1]
    tm = x_ref.shape[0]

    x = x_ref[...]                          # (tm, D_pad), compute dtype
    w1s_ref, b1_ref = wb[0], wb[1]
    b1 = b1_ref[...]                        # (1, H1_pad) f32

    # Layer 1: shared x tile, one pre-rolled weight per offset (weights stay in VMEM).
    hs = []
    for o in range(num_offsets):            # static, small (len(offsets))
        h_o = jnp.dot(x, w1s_ref[o], preferred_element_type=jnp.float32)
        hs.append(jnp.maximum(h_o + b1, 0.0))

    # Fold the offset dim into the matmul M dim: one dot per remaining layer.
    h = jnp.concatenate(hs, axis=0)         # (O*tm, H1_pad) f32

    for layer in range(1, n_layers):
        w_ref = wb[2 * layer]
        b_ref = wb[2 * layer + 1]
        h = jnp.dot(h.astype(w_ref.dtype), w_ref[...],
                    preferred_element_type=jnp.float32)
        h = jnp.maximum(h + b_ref[...], 0.0)

    h = h.reshape(num_offsets, tm, h.shape[-1])      # (O, tm, H_last_pad)
    if pooling == "mean":
        pooled = h.sum(axis=0) * (1.0 / num_offsets)  # const multiply, no divide
    else:
        pooled = h.max(axis=0)
    o_ref[...] = pooled.astype(o_ref.dtype)


def rotation_invariant_mlp(x, params, *, offsets=(-1, 0, 1), pooling="mean",
                           tm=256, compute_dtype=jnp.bfloat16):
    """x: (T, N, C, F) float32.  params: list of (W:(in,out), b:(1,out)) float32.

    Returns (T, N, mlp_features[-1]) float32.
    """
    assert pooling in ("mean", "max")
    assert tm % 16 == 0, "tm must be a multiple of 16 (bf16 sublane packing)"
    offsets = tuple(offsets) if len(offsets) > 0 else (0,)
    T, N, C, F = x.shape
    O = len(offsets)
    D_in = C * F
    M = T * N
    n_layers = len(params)
    assert n_layers >= 1 and params[0][0].shape[0] == D_in

    lane = 128
    D_pad = _round_up(D_in, lane)

    # --- Layer 1: fold the electrode roll into the weights (row permutation). ---
    # roll(x, off, axis=C).flatten() @ W1  ==  x.flatten() @ roll(W1_by_C, -off)
    w1, b1 = params[0]
    H1 = w1.shape[1]
    H1_pad = _round_up(H1, lane)
    w1_3d = w1.reshape(C, F, H1)
    w1_rolled = jnp.stack(
        [jnp.roll(w1_3d, -off, axis=0).reshape(D_in, H1) for off in offsets], axis=0)
    w1_rolled = jnp.pad(
        w1_rolled, ((0, 0), (0, D_pad - D_in), (0, H1_pad - H1))).astype(compute_dtype)
    b1_pad = jnp.pad(b1, ((0, 0), (0, H1_pad - H1))).astype(jnp.float32)

    padded = [(w1_rolled, b1_pad)]
    prev_pad = H1_pad
    for w, b in params[1:]:
        H = w.shape[1]
        H_pad = _round_up(H, lane)
        wp = jnp.pad(w, ((0, prev_pad - w.shape[0]), (0, H_pad - H))).astype(compute_dtype)
        bp = jnp.pad(b, ((0, 0), (0, H_pad - H))).astype(jnp.float32)
        padded.append((wp, bp))
        prev_pad = H_pad

    H_last = params[-1][0].shape[1]
    H_last_pad = prev_pad

    # --- Input: flatten rows, pad rows to a tile multiple and features to 128. ---
    M_pad = _round_up(M, tm)
    x2 = x.reshape(M, D_in)
    x2 = jnp.pad(x2, ((0, M_pad - M), (0, D_pad - D_in))).astype(compute_dtype)

    kernel = functools.partial(_ri_mlp_kernel, pooling, n_layers, O)

    in_specs = [pl.BlockSpec((tm, D_pad), lambda i: (i, 0))]
    flat_args = [x2]
    for idx, (wp, bp) in enumerate(padded):
        if idx == 0:
            in_specs.append(pl.BlockSpec(wp.shape, lambda i: (0, 0, 0)))
        else:
            in_specs.append(pl.BlockSpec(wp.shape, lambda i: (0, 0)))
        in_specs.append(pl.BlockSpec(bp.shape, lambda i: (0, 0)))
        flat_args.extend([wp, bp])

    # VMEM budget: double-buffered x/out tiles + resident weights + f32 temporaries.
    cbytes = jnp.dtype(compute_dtype).itemsize
    max_h_pad = max(H1_pad, *(w.shape[-1] for w, _ in padded))
    weight_bytes = sum(int(w.size) * w.dtype.itemsize + int(b.size) * b.dtype.itemsize
                       for w, b in padded)
    vmem_est = (2 * tm * D_pad * cbytes            # pipelined input tile
                + 2 * tm * H_last_pad * 4          # pipelined f32 output tile
                + weight_bytes                     # resident weights / biases
                + 4 * O * tm * max_h_pad * 4)      # f32 activation temps (headroom)
    # Cap below v7x's 64 MiB physical VMEM; never below the 32 MiB scoped default.
    vmem_limit = int(min(56 * 2**20, max(32 * 2**20, 2 * vmem_est)))

    # Note: at realistic T*N, M_pad//tm >> 2, so the parallel grid shards cleanly
    # across v7x's two TensorCores.  If the xprof trace ever shows exposed input
    # DMA, add pipeline_mode=pl.Buffered(3) to in_specs[0].
    out = pl.pallas_call(
        kernel,
        out_shape=jax.ShapeDtypeStruct((M_pad, H_last_pad), jnp.float32),
        grid_spec=pltpu.PrefetchScalarGridSpec(
            num_scalar_prefetch=0,
            grid=(M_pad // tm,),
            in_specs=in_specs,
            out_specs=pl.BlockSpec((tm, H_last_pad), lambda i: (i, 0)),
        ),
        compiler_params=pltpu.CompilerParams(
            dimension_semantics=("parallel",),
            vmem_limit_bytes=vmem_limit,
        ),
    )(*flat_args)

    return out[:M, :H_last].reshape(T, N, H_last)


def init_params(key, in_features, mlp_features):
    """Deterministic synthetic init matching nn.Linear's U(-1/sqrt(fan_in), 1/sqrt(fan_in))."""
    params = []
    fan_in = in_features
    for out_features in mlp_features:
        key, kw, kb = jax.random.split(key, 3)
        bound = 1.0 / math.sqrt(fan_in)
        w = jax.random.uniform(kw, (fan_in, out_features), jnp.float32, -bound, bound)
        b = jax.random.uniform(kb, (1, out_features), jnp.float32, -bound, bound)
        params.append((w, b))
        fan_in = out_features
    return params


def _reference_forward(x, params, offsets, pooling):
    """Pure-JAX mirror of the PyTorch forward (roll input, stack, MLP, pool)."""
    offsets = tuple(offsets) if len(offsets) > 0 else (0,)
    xs = jnp.stack([jnp.roll(x, off, axis=2) for off in offsets], axis=2)  # (T,N,O,C,F)
    h = xs.reshape(*xs.shape[:3], -1)                                       # (T,N,O,C*F)
    for w, b in params:
        h = jnp.maximum(h @ w + b, 0.0)
    if pooling == "max":
        return h.max(axis=2)
    return h.mean(axis=2)


if __name__ == "__main__":
    # Small shapes consistent with the module: (T, N, C, F), in_features = C*F.
    T, N, C, F = 8, 2, 4, 4
    in_features = C * F          # 16
    mlp_features = [32, 32]
    offsets = (-1, 0, 1)

    key = jax.random.PRNGKey(0)
    key_x, key_p = jax.random.split(key)
    x = jax.random.normal(key_x, (T, N, C, F), jnp.float32)
    params = init_params(key_p, in_features, mlp_features)

    for pooling in ("mean", "max"):
        ref = _reference_forward(x, params, offsets, pooling)

        # f32 operands: tight check of the rolled-weight / folded-offset kernel math.
        out32 = jax.block_until_ready(rotation_invariant_mlp(
            x, params, offsets=offsets, pooling=pooling, tm=64,
            compute_dtype=jnp.float32))
        assert out32.shape == (T, N, mlp_features[-1])
        assert jnp.allclose(out32, ref, atol=1e-4, rtol=1e-4)

        # bf16 operands (default fast path on v6e/v7x): f32 accumulation, looser tol.
        out16 = jax.block_until_ready(rotation_invariant_mlp(
            x, params, offsets=offsets, pooling=pooling, tm=256,
            compute_dtype=jnp.bfloat16))
        assert out16.shape == (T, N, mlp_features[-1])
        assert jnp.allclose(out16, ref, atol=5e-2, rtol=5e-2)

    print("KERNEL_OK")
</pallas_src>

<mosaic_0001>
module attributes {stable_mosaic.version = 11 : i64} {
  func.func @_ri_mlp_kernel(%arg0: i32, %arg1: memref<64x128xf32, #tpu.memory_space<vmem>>, %arg2: memref<3x128x128xf32, #tpu.memory_space<vmem>>, %arg3: memref<1x128xf32, #tpu.memory_space<vmem>>, %arg4: memref<128x128xf32, #tpu.memory_space<vmem>>, %arg5: memref<1x128xf32, #tpu.memory_space<vmem>>, %arg6: memref<64x128xf32, #tpu.memory_space<vmem>>) attributes {dimension_semantics = [#tpu.dimension_semantics<parallel>], iteration_bounds = array<i64: 1>, scalar_prefetch = 0 : i64, scratch_operands = 0 : i64, tpu.core_type = #tpu.core_type<tc>, window_params = [{transform_indices = @transform_0, window_bounds = array<i64: 64, 128>}, {pipeline_mode = #tpu.pipeline_mode<synchronous>, transform_indices = @transform_1, window_bounds = array<i64: 3, 128, 128>}, {pipeline_mode = #tpu.pipeline_mode<synchronous>, transform_indices = @transform_2, window_bounds = array<i64: 1, 128>}, {pipeline_mode = #tpu.pipeline_mode<synchronous>, transform_indices = @transform_3, window_bounds = array<i64: 128, 128>}, {pipeline_mode = #tpu.pipeline_mode<synchronous>, transform_indices = @transform_4, window_bounds = array<i64: 1, 128>}, {transform_indices = @transform_5, window_bounds = array<i64: 64, 128>}]} {
    %c0 = arith.constant 0 : index
    %c0_0 = arith.constant 0 : index
    %0 = vector.load %arg1[%c0, %c0_0] : memref<64x128xf32, #tpu.memory_space<vmem>>, vector<64x128xf32>
    %c0_1 = arith.constant 0 : index
    %c0_2 = arith.constant 0 : index
    %1 = vector.load %arg3[%c0_1, %c0_2] : memref<1x128xf32, #tpu.memory_space<vmem>>, vector<1x128xf32>
    %c0_3 = arith.constant 0 : index
    %c0_4 = arith.constant 0 : index
    %c0_5 = arith.constant 0 : index
    %2 = vector.load %arg2[%c0_3, %c0_4, %c0_5] : memref<3x128x128xf32, #tpu.memory_space<vmem>>, vector<1x128x128xf32>
    %3 = vector.shape_cast %2 : vector<1x128x128xf32> to vector<128x128xf32>
    %cst = arith.constant dense<0.000000e+00> : vector<64x128xf32>
    %4 = tpu.matmul %0, %3, %cst {dimension_numbers = #tpu.dot_dimension_numbers<[1], [0], [0], [1], [0, 0, 1, 1], [], []>} : vector<64x128xf32>, vector<128x128xf32>, vector<64x128xf32> -> vector<64x128xf32>
    %5 = vector.broadcast %1 : vector<1x128xf32> to vector<64x128xf32>
    %6 = arith.addf %4, %5 : vector<64x128xf32>
    %cst_6 = arith.constant 0.000000e+00 : f32
    %7 = vector.broadcast %cst_6 : f32 to vector<64x128xf32>
    %8 = arith.maximumf %6, %7 : vector<64x128xf32>
    %c1 = arith.constant 1 : index
    %c0_7 = arith.constant 0 : index
    %c0_8 = arith.constant 0 : index
    %9 = vector.load %arg2[%c1, %c0_7, %c0_8] : memref<3x128x128xf32, #tpu.memory_space<vmem>>, vector<1x128x128xf32>
    %10 = vector.shape_cast %9 : vector<1x128x128xf32> to vector<128x128xf32>
    %cst_9 = arith.constant dense<0.000000e+00> : vector<64x128xf32>
    %11 = tpu.matmul %0, %10, %cst_9 {dimension_numbers = #tpu.dot_dimension_numbers<[1], [0], [0], [1], [0, 0, 1, 1], [], []>} : vector<64x128xf32>, vector<128x128xf32>, vector<64x128xf32> -> vector<64x128xf32>
    %12 = vector.broadcast %1 : vector<1x128xf32> to vector<64x128xf32>
    %13 = arith.addf %11, %12 : vector<64x128xf32>
    %cst_10 = arith.constant 0.000000e+00 : f32
    %14 = vector.broadcast %cst_10 : f32 to vector<64x128xf32>
    %15 = arith.maximumf %13, %14 : vector<64x128xf32>
    %c2 = arith.constant 2 : index
    %c0_11 = arith.constant 0 : index
    %c0_12 = arith.constant 0 : index
    %16 = vector.load %arg2[%c2, %c0_11, %c0_12] : memref<3x128x128xf32, #tpu.memory_space<vmem>>, vector<1x128x128xf32>
    %17 = vector.shape_cast %16 : vector<1x128x128xf32> to vector<128x128xf32>
    %cst_13 = arith.constant dense<0.000000e+00> : vector<64x128xf32>
    %18 = tpu.matmul %0, %17, %cst_13 {dimension_numbers = #tpu.dot_dimension_numbers<[1], [0], [0], [1], [0, 0, 1, 1], [], []>} : vector<64x128xf32>, vector<128x128xf32>, vector<64x128xf32> -> vector<64x128xf32>
    %19 = vector.broadcast %1 : vector<1x128xf32> to vector<64x128xf32>
    %20 = arith.addf %18, %19 : vector<64x128xf32>
    %cst_14 = arith.constant 0.000000e+00 : f32
    %21 = vector.broadcast %cst_14 : f32 to vector<64x128xf32>
    %22 = arith.maximumf %20, %21 : vector<64x128xf32>
    %23 = tpu.concatenate %8, %15, %22 in 0 : vector<64x128xf32>, vector<64x128xf32>, vector<64x128xf32> -> vector<192x128xf32>
    %c0_15 = arith.constant 0 : index
    %c0_16 = arith.constant 0 : index
    %24 = vector.load %arg4[%c0_15, %c0_16] : memref<128x128xf32, #tpu.memory_space<vmem>>, vector<128x128xf32>
    %cst_17 = arith.constant dense<0.000000e+00> : vector<192x128xf32>
    %25 = tpu.matmul %23, %24, %cst_17 {dimension_numbers = #tpu.dot_dimension_numbers<[1], [0], [0], [1], [0, 0, 1, 1], [], []>} : vector<192x128xf32>, vector<128x128xf32>, vector<192x128xf32> -> vector<192x128xf32>
    %c0_18 = arith.constant 0 : index
    %c0_19 = arith.constant 0 : index
    %26 = vector.load %arg5[%c0_18, %c0_19] : memref<1x128xf32, #tpu.memory_space<vmem>>, vector<1x128xf32>
    %27 = vector.broadcast %26 : vector<1x128xf32> to vector<192x128xf32>
    %28 = arith.addf %25, %27 : vector<192x128xf32>
    %cst_20 = arith.constant 0.000000e+00 : f32
    %29 = vector.broadcast %cst_20 : f32 to vector<192x128xf32>
    %30 = arith.maximumf %28, %29 : vector<192x128xf32>
    %31 = vector.shape_cast %30 : vector<192x128xf32> to vector<3x64x128xf32>
    %cst_21 = arith.constant dense<0.000000e+00> : vector<64x128xf32>
    %32 = vector.multi_reduction <add>, %31, %cst_21 [0] : vector<3x64x128xf32> to vector<64x128xf32>
    %cst_22 = arith.constant 0.333333343 : f32
    %33 = vector.broadcast %cst_22 : f32 to vector<64x128xf32>
    %34 = arith.mulf %32, %33 : vector<64x128xf32>
    %c0_23 = arith.constant 0 : index
    %c0_24 = arith.constant 0 : index
    %35 = vector.load %arg6[%c0_23, %c0_24] : memref<64x128xf32, #tpu.memory_space<vmem>>, vector<64x128xf32>
    tpu.vector_store %arg6[%c0_23, %c0_24], %34 {strides = array<i32>} : memref<64x128xf32, #tpu.memory_space<vmem>>, vector<64x128xf32>,
    return
  }
  func.func @transform_0(%arg0: i32) -> (i32, i32) {
    %c0_i32 = arith.constant 0 : i32
    %c0_i32_0 = arith.constant 0 : i32
    return %arg0, %c0_i32 : i32, i32
  }
  func.func @transform_1(%arg0: i32) -> (i32, i32, i32) {
    %c0_i32 = arith.constant 0 : i32
    %c0_i32_0 = arith.constant 0 : i32
    %c0_i32_1 = arith.constant 0 : i32
    %c0_i32_2 = arith.constant 0 : i32
    return %c0_i32, %c0_i32_0, %c0_i32_1 : i32, i32, i32
  }
  func.func @transform_2(%arg0: i32) -> (i32, i32) {
    %c0_i32 = arith.constant 0 : i32
    %c0_i32_0 = arith.constant 0 : i32
    %c0_i32_1 = arith.constant 0 : i32
    return %c0_i32, %c0_i32_0 : i32, i32
  }
  func.func @transform_3(%arg0: i32) -> (i32, i32) {
    %c0_i32 = arith.constant 0 : i32
    %c0_i32_0 = arith.constant 0 : i32
    %c0_i32_1 = arith.constant 0 : i32
    return %c0_i32, %c0_i32_0 : i32, i32
  }
  func.func @transform_4(%arg0: i32) -> (i32, i32) {
    %c0_i32 = arith.constant 0 : i32
    %c0_i32_0 = arith.constant 0 : i32
    %c0_i32_1 = arith.constant 0 : i32
    return %c0_i32, %c0_i32_0 : i32, i32
  }
  func.func @transform_5(%arg0: i32) -> (i32, i32) {
    %c0_i32 = arith.constant 0 : i32
    %c0_i32_0 = arith.constant 0 : i32
    return %arg0, %c0_i32 : i32, i32
  }
}

</mosaic_0001>

<bundles_post_ra>
// kernel: tpu_custom_call.1
= control target key start
LH: loop header
LB: loop body
LE: loop exit
PB: predicated region body
PF: predicated region fallthrough
CT: control target
= control target key end

     0   :  { %10 = vsyncpa [#allocation3], 0  ;;  %s1514_s0 = inlined_call_operand.hbm [shape: f32[64,128], index: 0, kind: input, shape index: {}]   ;;  %s1515_s1 = inlined_call_operand.hbm [shape: f32[3,128,128], index: 1, kind: input, shape index: {}]   ;;  %s1516_s2 = inlined_call_operand.vmem [shape: f32[1,128], index: 2, kind: input, shape index: {}]   ;;  %s1517_s3 = inlined_call_operand.hbm [shape: f32[128,128], index: 3, kind: input, shape index: {}]   ;;  %s1518_s4 = inlined_call_operand.vmem [shape: f32[1,128], index: 4, kind: input, shape index: {}]   ;;  %s1519_s5 = inlined_call_operand.hbm [shape: f32[64,128], index: 5, kind: output, shape index: {}]  }
   0x1   :  { %11 = vsyncpa [#allocation6], 0 }
   0x2   :  { %12 = vsyncpa [#allocation4], 0  ;;  %s1306_s18 = smov [#allocation5]   ;;  %s1307_s20 = smov [#allocation2]  }
   0x3   :  { %s30_s19 = sshll.u32 %s1306_s18, 4  ;;  %s18_s21 = sshll.u32 %s1307_s20, 4  ;;  %s31_s19 = int_to_ptr.vmem [resolvable:$true] %s30_s19  ;;  %s1342_s21 = int_to_ptr.vmem [resolvable:$true] %s18_s21 }
   0x4   :  { %s1212_s24 = scalar_lea.hbm %s1515_s1, 6144 }
   0x5   :  { %p1213_p0 = scmp.ne.s32.totalorder %s1515_s1, %s1212_s24  ;;  %p1216_p1 = scmp.lt.u32.totalorder %s1212_s24, %s1515_s1 }
   0x7   :  { %p1218_p2 = pnand %p1216_p1, %p1213_p0 }
   0x9   :  { %1221 = shalt.err (!%p1218_p2)
}
   0xa   :  { %s1222_s29 = scalar_lea.vmem %s31_s19, 6144  ;;  %p1227_p4 = scmp.lt.s32.totalorder %s31_s19, %s31_s19 }
   0xb   :  { %p1223_p3 = scmp.ne.s32.totalorder %s31_s19, %s1222_s29  ;;  %p1228_p5 = scmp.lt.s32.totalorder %s1222_s29, %s1222_s29 }
   0xd   :  { %p1229_p6 = por %p1228_p5, %p1227_p4 }
   0xf   :  { %p1230_p7 = pnand %p1229_p6, %p1223_p3 }
  0x11   :  { %1233 = shalt.err (!%p1230_p7)
}
  0x12   :  { %s1308_s30 = smov 128   ;;  %s1309_s6 = smov 8  }
  0x13   :  { %36 = dma.hbm_to_vmem [thread:$0]  %s1515_s1, 6144, %s31_s19, [#allocation6], %s1308_s30, %s1308_s30, %s1309_s6  }
  0x14   :  { %s1234_s11 = scalar_lea.hbm %s1514_s0, 1024 }
  0x15   :  { %p1235_p8 = scmp.ne.s32.totalorder %s1514_s0, %s1234_s11  ;;  %p1238_p9 = scmp.lt.u32.totalorder %s1234_s11, %s1514_s0 }
  0x17   :  { %p1240_p10 = pnand %p1238_p9, %p1235_p8 }
  0x19   :  { %1243 = shalt.err (!%p1240_p10)
}
  0x1a   :  { %s1244_s16 = scalar_lea.vmem %s1342_s21, 1024  ;;  %p1249_p12 = scmp.lt.s32.totalorder %s1342_s21, %s1342_s21 }
  0x1b   :  { %p1245_p11 = scmp.ne.s32.totalorder %s1342_s21, %s1244_s16  ;;  %p1250_p13 = scmp.lt.s32.totalorder %s1244_s16, %s1244_s16 }
  0x1d   :  { %p1251_p0 = por %p1250_p13, %p1249_p12 }
  0x1f   :  { %p1252_p1 = pnand %p1251_p0, %p1245_p11 }
  0x21   :  { %1255 = shalt.err (!%p1252_p1)
}
  0x22   :  { %24 = dma.hbm_to_vmem [thread:$0]  %s1514_s0, 1024, %s1342_s21, [#allocation3], %s1308_s30, %s1308_s30, %s1309_s6  }
  0x23   :  { %s1310_s18 = smov [#allocation7]   ;;  %s1256_s23 = scalar_lea.hbm %s1517_s3, 2048 }
  0x24   :  { %s44_s19 = sshll.u32 %s1310_s18, 4  ;;  %p1257_p2 = scmp.ne.s32.totalorder %s1517_s3, %s1256_s23  ;;  %s45_s19 = int_to_ptr.vmem [resolvable:$true] %s44_s19 }
  0x25   :  { %p1260_p3 = scmp.lt.u32.totalorder %s1256_s23, %s1517_s3 }
  0x27   :  { %p1262_p4 = pnand %p1260_p3, %p1257_p2 }
  0x29   :  { %1265 = shalt.err (!%p1262_p4)
}
  0x2a   :  { %s1266_s28 = scalar_lea.vmem %s45_s19, 2048  ;;  %p1271_p6 = scmp.lt.s32.totalorder %s45_s19, %s45_s19 }
  0x2b   :  { %p1267_p5 = scmp.ne.s32.totalorder %s45_s19, %s1266_s28  ;;  %p1272_p7 = scmp.lt.s32.totalorder %s1266_s28, %s1266_s28 }
  0x2d   :  { %p1273_p8 = por %p1272_p7, %p1271_p6 }
  0x2f   :  { %p1274_p9 = pnand %p1273_p8, %p1267_p5 }
  0x31   :  { %1277 = shalt.err (!%p1274_p9)
}
  0x32   :  { %50 = dma.hbm_to_vmem [thread:$0]  %s1517_s3, 2048, %s45_s19, [#allocation6], %s1308_s30, %s1308_s30, %s1309_s6  }
  0x33   :  { %1300 = dma.done.wait [#allocation3], 1024  }
  0x34   :  { %1301 = vsyncadd [#allocation3], 4294966272 }
  0x35   :  { %1302 = dma.done.wait [#allocation6], 8192  }
  0x36   :  { %1303 = vsyncadd [#allocation6], 4294959104  ;;  %v71_v0 = vld [vmem:[#allocation5] sm:$0xff]  ;;  %v72_v1 = vld [vmem:[#allocation5 + $0x8] sm:$0xff] }
  0x37   :  { %v73_v2 = vld [vmem:[#allocation5 + $0x10] sm:$0xff]  ;;  %v1062_v3 = vpack.c.bf16 %v72_v1, %v71_v0  ;;  %v74_v4 = vld [vmem:[#allocation5 + $0x18] sm:$0xff]  ;;  %v75_v6 = vld [vmem:[#allocation5 + $0x20] sm:$0xff] }
  0x38   :  { %v1066_v5 = vpack.c.bf16 %v74_v4, %v73_v2  ;;  %v76_v7 = vld [vmem:[#allocation5 + $0x28] sm:$0xff]  ;;  %v207_v8 = vld [vmem:[#allocation5 + $0x80] sm:$0xff]  ;;  %v209_v11 = vld [vmem:[#allocation5 + $0x90] sm:$0xff] }
  0x39   :  { %1063 = vmatprep.subr.bf16.mxu0 %v1062_v3  ;;  %v208_v9 = vld [vmem:[#allocation5 + $0x88] sm:$0xff]  ;;  %v210_v12 = vld [vmem:[#allocation5 + $0x98] sm:$0xff]  ;;  %v1070_v13 = vpack.c.bf16 %v76_v7, %v75_v6  ;;  %v211_v15 = vld [vmem:[#allocation5 + $0xa0] sm:$0xff] }
  0x3a   :  { %1065 = vmatpush3.bf16.msra.mxu0 %v1062_v3  ;;  %v1094_v10 = vpack.c.bf16 %v208_v9, %v207_v8  ;;  %v1098_v14 = vpack.c.bf16 %v210_v12, %v209_v11  ;;  %v212_v16 = vld [vmem:[#allocation5 + $0xa8] sm:$0xff]  ;;  %v77_v17 = vld [vmem:[#allocation5 + $0x30] sm:$0xff]  ;;  %v78_v18 = vld [vmem:[#allocation5 + $0x38] sm:$0xff] }
  0x3b   :  { %1067 = vmatprep.subr.bf16.mxu0 %v1066_v5  ;;  %v1102_v19 = vpack.c.bf16 %v212_v16, %v211_v15  ;;  %v1394_v20 = vld [vmem:[#allocation2] sm:$0xff]  ;;  %v1074_v21 = vpack.c.bf16 %v78_v18, %v77_v17  ;;  %v213_v22 = vld [vmem:[#allocation5 + $0xb0] sm:$0xff]  ;;  %v214_v23 = vld [vmem:[#allocation5 + $0xb8] sm:$0xff] }
  0x3c   :  { %1095 = vmatprep.subr.bf16.mxu1 %v1094_v10  ;;  %894 = vmatprep.mubr.f32.mxu0 %v1394_v20  ;;  %v79_v24 = vld [vmem:[#allocation5 + $0x40] sm:$0xff]  ;;  %v80_v25 = vld [vmem:[#allocation5 + $0x48] sm:$0xff]  ;;  %v1106_v26 = vpack.c.bf16 %v214_v23, %v213_v22  ;;  %v81_v30 = vld [vmem:[#allocation5 + $0x50] sm:$0xff] }
  0x3d   :  { %1097 = vmatpush3.bf16.msra.mxu1 %v1094_v10  ;;  %938 = vmatprep.mubr.f32.mxu1 %v1394_v20  ;;  %v1078_v27 = vpack.c.bf16 %v80_v25, %v79_v24  ;;  %v215_v28 = vld [vmem:[#allocation5 + $0xc0] sm:$0xff]  ;;  %v216_v29 = vld [vmem:[#allocation5 + $0xc8] sm:$0xff]  ;;  %v82_v31 = vld [vmem:[#allocation5 + $0x58] sm:$0xff] }
  0x3e   :  { %1069 = vmatpush3.bf16.msra.mxu0 %v1066_v5  ;;  %1099 = vmatprep.subr.bf16.mxu1 %v1098_v14  ;;  %v1110_v32 = vpack.c.bf16 %v216_v29, %v215_v28  ;;  %v1082_v33 = vpack.c.bf16 %v82_v31, %v81_v30  ;;  %v217_v34 = vld [vmem:[#allocation5 + $0xd0] sm:$0xff]  ;;  %v218_v35 = vld [vmem:[#allocation5 + $0xd8] sm:$0xff]  ;;  %v83_v36 = vld [vmem:[#allocation5 + $0x60] sm:$0xff] }
  0x3f   :  { %1071 = vmatprep.subr.bf16.mxu0 %v1070_v13  ;;  %v84_v37 = vld [vmem:[#allocation5 + $0x68] sm:$0xff]  ;;  %v1114_v38 = vpack.c.bf16 %v218_v35, %v217_v34  ;;  %v219_v40 = vld [vmem:[#allocation5 + $0xe0] sm:$0xff]  ;;  %v85_v42 = vld [vmem:[#allocation5 + $0x70] sm:$0xff] }
  0x40   :  { %v1086_v39 = vpack.c.bf16 %v84_v37, %v83_v36  ;;  %v220_v41 = vld [vmem:[#allocation5 + $0xe8] sm:$0xff]  ;;  %v86_v43 = vld [vmem:[#allocation5 + $0x78] sm:$0xff]  ;;  %v221_v46 = vld [vmem:[#allocation5 + $0xf0] sm:$0xff] }
  0x41   :  { %1101 = vmatpush3.bf16.msra.mxu1 %v1098_v14  ;;  %v1118_v44 = vpack.c.bf16 %v220_v41, %v219_v40  ;;  %v1090_v45 = vpack.c.bf16 %v86_v43, %v85_v42  ;;  %v222_v47 = vld [vmem:[#allocation5 + $0xf8] sm:$0xff]  ;;  %v337_v48 = vld [vmem:[#allocation5 + $0x100] sm:$0xff]  ;;  %v338_v49 = vld [vmem:[#allocation5 + $0x108] sm:$0xff] }
  0x42   :  { %1073 = vmatpush3.bf16.msra.mxu0 %v1070_v13  ;;  %1103 = vmatprep.subr.bf16.mxu1 %v1102_v19  ;;  %v1122_v50 = vpack.c.bf16 %v222_v47, %v221_v46  ;;  %v1126_v51 = vpack.c.bf16 %v338_v49, %v337_v48  ;;  %v339_v52 = vld [vmem:[#allocation5 + $0x110] sm:$0xff]  ;;  %v340_v53 = vld [vmem:[#allocation5 + $0x118] sm:$0xff]  ;;  %v1398_v54 = vld [vmem:[#allocation2 + $0x8] sm:$0xff] }
  0x43   :  { %1075 = vmatprep.subr.bf16.mxu0 %v1074_v21  ;;  %v466_v55 = vld [vmem:[#allocation7] sm:$0xff]  ;;  %v467_v56 = vld [vmem:[#allocation7 + $0x8] sm:$0xff]  ;;  %v1400_v57 = vld [vmem:[#allocation2 + $0x10] sm:$0xff]  ;;  %v1130_v58 = vpack.c.bf16 %v340_v53, %v339_v52 }
  0x44   :  { %v341_v59 = vld [vmem:[#allocation5 + $0x120] sm:$0xff]  ;;  %v342_v60 = vld [vmem:[#allocation5 + $0x128] sm:$0xff]  ;;  %v1403_v61 = vpack.c.bf16 %v467_v56, %v466_v55  ;;  %v1406_v62 = vld [vmem:[#allocation2 + $0x18] sm:$0xff] }
  0x45   :  { %1105 = vmatpush3.bf16.msra.mxu1 %v1102_v19  ;;  %v1408_v63 = vld [vmem:[#allocation2 + $0x20] sm:$0xff]  ;;  %v1134_v0 = vpack.c.bf16 %v342_v60, %v341_v59  ;;  %v468_v1 = vld [vmem:[#allocation7 + $0x10] sm:$0xff]  ;;  %v469_v2 = vld [vmem:[#allocation7 + $0x18] sm:$0xff] }
  0x46   :  { %1077 = vmatpush3.bf16.msra.mxu0 %v1074_v21  ;;  %1107 = vmatprep.subr.bf16.mxu1 %v1106_v26  ;;  %v343_v3 = vld [vmem:[#allocation5 + $0x130] sm:$0xff]  ;;  %v344_v4 = vld [vmem:[#allocation5 + $0x138] sm:$0xff]  ;;  %v1415_v5 = vld [vmem:[#allocation2 + $0x28] sm:$0xff]  ;;  %v1417_v6 = vpack.c.bf16 %v469_v2, %v468_v1 }
  0x47   :  { %1079 = vmatprep.subr.bf16.mxu0 %v1078_v27  ;;  %v1419_v7 = vld [vmem:[#allocation2 + $0x30] sm:$0xff]  ;;  %v1138_v8 = vpack.c.bf16 %v344_v4, %v343_v3  ;;  %v470_v9 = vld [vmem:[#allocation7 + $0x20] sm:$0xff]  ;;  %v471_v10 = vld [vmem:[#allocation7 + $0x28] sm:$0xff] }
  0x48   :  { %v345_v11 = vld [vmem:[#allocation5 + $0x140] sm:$0xff]  ;;  %v346_v12 = vld [vmem:[#allocation5 + $0x148] sm:$0xff]  ;;  %v69_v13 = vld [vmem:[#allocation2 + $0x38] sm:$0xff]  ;;  %v1166_v14 = vpack.c.bf16 %v471_v10, %v470_v9 }
  0x49   :  { %1109 = vmatpush3.bf16.msra.mxu1 %v1106_v26  ;;  %v1142_v15 = vpack.c.bf16 %v346_v12, %v345_v11  ;;  %v472_v16 = vld [vmem:[#allocation7 + $0x30] sm:$0xff]  ;;  %v473_v17 = vld [vmem:[#allocation7 + $0x38] sm:$0xff]  ;;  %v474_v23 = vld [vmem:[#allocation7 + $0x40] sm:$0xff] }
  0x4a   :  { %1081 = vmatpush3.bf16.msra.mxu0 %v1078_v27  ;;  %1111 = vmatprep.subr.bf16.mxu1 %v1110_v32  ;;  %v347_v18 = vld [vmem:[#allocation5 + $0x150] sm:$0xff]  ;;  %v348_v19 = vld [vmem:[#allocation5 + $0x158] sm:$0xff]  ;;  %v1170_v21 = vpack.c.bf16 %v473_v17, %v472_v16  ;;  %v475_v24 = vld [vmem:[#allocation7 + $0x48] sm:$0xff] }
  0x4b   :  { %1083 = vmatprep.subr.bf16.mxu0 %v1082_v33  ;;  %v1146_v22 = vpack.c.bf16 %v348_v19, %v347_v18  ;;  %v349_v25 = vld [vmem:[#allocation5 + $0x160] sm:$0xff]  ;;  %v350_v26 = vld [vmem:[#allocation5 + $0x168] sm:$0xff]  ;;  %v1174_v27 = vpack.c.bf16 %v475_v24, %v474_v23  ;;  %v476_v29 = vld [vmem:[#allocation7 + $0x50] sm:$0xff] }
  0x4c   :  { %v1150_v28 = vpack.c.bf16 %v350_v26, %v349_v25  ;;  %v477_v30 = vld [vmem:[#allocation7 + $0x58] sm:$0xff]  ;;  %v351_v31 = vld [vmem:[#allocation5 + $0x170] sm:$0xff]  ;;  %v478_v34 = vld [vmem:[#allocation7 + $0x60] sm:$0xff] }
  0x4d   :  { %1113 = vmatpush3.bf16.msra.mxu1 %v1110_v32  ;;  %v352_v32 = vld [vmem:[#allocation5 + $0x178] sm:$0xff]  ;;  %v479_v35 = vld [vmem:[#allocation7 + $0x68] sm:$0xff]  ;;  %v480_v37 = vld [vmem:[#allocation7 + $0x70] sm:$0xff] }
  0x4e   :  { %1085 = vmatpush3.bf16.msra.mxu0 %v1082_v33  ;;  %1115 = vmatprep.subr.bf16.mxu1 %v1114_v38  ;;  %v1154_v33 = vpack.c.bf16 %v352_v32, %v351_v31  ;;  %v1182_v36 = vpack.c.bf16 %v479_v35, %v478_v34  ;;  %v1444_v40 = vld [vmem:[%s1516_s2] ss:$0 sm:$0xff] }
  0x4f   :  { %1087 = vmatprep.subr.bf16.mxu0 %v1086_v39 }
  0x51   :  { %1117 = vmatpush3.bf16.msra.mxu1 %v1114_v38  ;;  %v481_v38 = vld [vmem:[#allocation7 + $0x78] sm:$0xff] }
  0x52   :  { %1089 = vmatpush3.bf16.msra.mxu0 %v1086_v39  ;;  %1119 = vmatprep.subr.bf16.mxu1 %v1118_v44  ;;  %v1186_v39 = vpack.c.bf16 %v481_v38, %v480_v37 }
  0x53   :  { %1091 = vmatprep.subr.bf16.mxu0 %v1090_v45 }
  0x55   :  { %1121 = vmatpush3.bf16.msra.mxu1 %v1118_v44 }
  0x56   :  { %1093 = vmatpush3.bf16.msra.mxu0 %v1090_v45  ;;  %1123 = vmatprep.subr.bf16.mxu1 %v1122_v50 }
  0x57   :  { %1127 = vmatprep.subr.bf16.mxu0 %v1126_v51 }
  0x59   :  { %895 = vmatmul.mubr.f32.vlgmr.msra.gmra.mrb[0].mxu0 %v1398_v54  ;;  %1125 = vmatpush3.bf16.msra.mxu1 %v1122_v50 }
  0x5a   :  { %1129 = vmatpush3.bf16.msra.mxu0 %v1126_v51  ;;  %897 = vmatprep.mubr.f32.mxu0 %v1400_v57 }
  0x5b   :  { %1131 = vmatprep.subr.bf16.mxu0 %v1130_v58  ;;  %1190 = vmatprep.subr.bf16.mxu1 %v1403_v61 }
  0x5c   :  { %939 = vmatmul.mubr.f32.vlgmr.msra.gmra.mrb[0].mxu1 %v1398_v54 }
  0x5d   :  { %898 = vmatmul.mubr.f32.gmra.mrb[2].mxu0 %v1406_v62  ;;  %941 = vmatprep.mubr.f32.mxu1 %v1400_v57 }
  0x5e   :  { %1133 = vmatpush3.bf16.msra.mxu0 %v1130_v58  ;;  %900 = vmatprep.mubr.f32.mxu0 %v1408_v63 }
  0x5f   :  { %1135 = vmatprep.subr.bf16.mxu0 %v1134_v0  ;;  %1198 = vmatpush3.bf16.msra.mxu1 %v1403_v61 }
  0x60   :  { %942 = vmatmul.mubr.f32.gmra.mrb[2].mxu1 %v1406_v62  ;;  %1191 = vmatprep.subr.bf16.mxu1 %v1417_v6 }
  0x61   :  { %901 = vmatmul.mubr.f32.gmra.mrb[4].mxu0 %v1415_v5  ;;  %944 = vmatprep.mubr.f32.mxu1 %v1408_v63 }
  0x62   :  { %1137 = vmatpush3.bf16.msra.mxu0 %v1134_v0  ;;  %903 = vmatprep.mubr.f32.mxu0 %v1419_v7 }
  0x63   :  { %1139 = vmatprep.subr.bf16.mxu0 %v1138_v8  ;;  %1199 = vmatpush3.bf16.msra.mxu1 %v1417_v6 }
  0x64   :  { %945 = vmatmul.mubr.f32.gmra.mrb[4].mxu1 %v1415_v5  ;;  %1192 = vmatprep.subr.bf16.mxu1 %v1166_v14 }
  0x65   :  { %904 = vmatmul.mubr.f32.gmra.mrb[6].mxu0 %v69_v13  ;;  %947 = vmatprep.mubr.f32.mxu1 %v1419_v7 }
  0x66   :  { %1141 = vmatpush3.bf16.msra.mxu0 %v1138_v8  ;;  %982 = vmatprep.mubr.f32.mxu0 %v1394_v20  ;;  %v1178_v20 = vpack.c.bf16 %v477_v30, %v476_v29 }
  0x67   :  { %1143 = vmatprep.subr.bf16.mxu0 %v1142_v15  ;;  %1200 = vmatpush3.bf16.msra.mxu1 %v1166_v14 }
  0x68   :  { %948 = vmatmul.mubr.f32.gmra.mrb[6].mxu1 %v69_v13  ;;  %1193 = vmatprep.subr.bf16.mxu1 %v1170_v21 }
  0x6a   :  { %1145 = vmatpush3.bf16.msra.mxu0 %v1142_v15 }
  0x6b   :  { %1147 = vmatprep.subr.bf16.mxu0 %v1146_v22  ;;  %1201 = vmatpush3.bf16.msra.mxu1 %v1170_v21 }
  0x6c   :  { %1194 = vmatprep.subr.bf16.mxu1 %v1174_v27 }
  0x6e   :  { %1149 = vmatpush3.bf16.msra.mxu0 %v1146_v22 }
  0x6f   :  { %1151 = vmatprep.subr.bf16.mxu0 %v1150_v28  ;;  %1202 = vmatpush3.bf16.msra.mxu1 %v1174_v27 }
  0x70   :  { %1195 = vmatprep.subr.bf16.mxu1 %v1178_v20 }
  0x72   :  { %1153 = vmatpush3.bf16.msra.mxu0 %v1150_v28 }
  0x73   :  { %1155 = vmatprep.subr.bf16.mxu0 %v1154_v33  ;;  %1203 = vmatpush3.bf16.msra.mxu1 %v1178_v20 }
  0x74   :  { %1196 = vmatprep.subr.bf16.mxu1 %v1182_v36 }
  0x76   :  { %1157 = vmatpush3.bf16.msra.mxu0 %v1154_v33 }
  0x77   :  { %1159 = vmatprep.subr.bf16.mxu0 %v1403_v61  ;;  %1204 = vmatpush3.bf16.msra.mxu1 %v1182_v36 }
  0x78   :  { %1197 = vmatprep.subr.bf16.mxu1 %v1186_v39 }
  0x79   :  { %983 = vmatmul.mubr.f32.vlgmr.msra.gmra.mrb[8].mxu0 %v1398_v54 }
  0x7a   :  { %985 = vmatprep.mubr.f32.mxu0 %v1400_v57  ;;  %1161 = vmatpush3.bf16.msra.mxu0 %v1403_v61 }
  0x7b   :  { %1163 = vmatprep.subr.bf16.mxu0 %v1417_v6  ;;  %1205 = vmatpush3.bf16.msra.mxu1 %v1186_v39 }
  0x7d   :  { %986 = vmatmul.mubr.f32.gmra.mrb[10].mxu0 %v1406_v62 }
  0x7e   :  { %988 = vmatprep.mubr.f32.mxu0 %v1408_v63  ;;  %1165 = vmatpush3.bf16.msra.mxu0 %v1417_v6 }
  0x7f   :  { %1167 = vmatprep.subr.bf16.mxu0 %v1166_v14 }
  0x81   :  { %989 = vmatmul.mubr.f32.gmra.mrb[12].mxu0 %v1415_v5 }
  0x82   :  { %991 = vmatprep.mubr.f32.mxu0 %v1419_v7  ;;  %1169 = vmatpush3.bf16.msra.mxu0 %v1166_v14 }
  0x83   :  { %1171 = vmatprep.subr.bf16.mxu0 %v1170_v21 }
  0x85   :  { %992 = vmatmul.mubr.f32.gmra.mrb[14].mxu0 %v69_v13 }
  0x86   :  { %1173 = vmatpush3.bf16.msra.mxu0 %v1170_v21 }
  0x87   :  { %1175 = vmatprep.subr.bf16.mxu0 %v1174_v27 }
  0x8a   :  { %1177 = vmatpush3.bf16.msra.mxu0 %v1174_v27 }
  0x8b   :  { %1179 = vmatprep.subr.bf16.mxu0 %v1178_v20 }
  0x8e   :  { %1181 = vmatpush3.bf16.msra.mxu0 %v1178_v20 }
  0x8f   :  { %1183 = vmatprep.subr.bf16.mxu0 %v1182_v36 }
  0x92   :  { %1185 = vmatpush3.bf16.msra.mxu0 %v1182_v36 }
  0x93   :  { %1187 = vmatprep.subr.bf16.mxu0 %v1186_v39 }
  0x96   :  { %1189 = vmatpush3.bf16.msra.mxu0 %v1186_v39 }
 0x12c   :  { %v896_v41 = vpop.f32.mrb[0].mxu0 }
 0x12d   :  { %v165_v42 = vadd.f32 %v896_v41, %v1444_v40  ;;  %v159_v43 = vpop.f32.mrb[1].mxu0 }
 0x12e   :  { %v160_v44 = vadd.f32 %v1444_v40, %v159_v43 }
 0x12f   :  { %v940_v45 = vpop.f32.mrb[0].mxu1  ;;  %v199_v49 = vmax.f32 %v165_v42, 0.0 }
 0x130   :  { %v198_v46 = vmax.f32 %v160_v44, 0.0  ;;  %v899_v47 = vpop.f32.mrb[2].mxu0  ;;  %v289_v48 = vpop.f32.mrb[1].mxu1  ;;  %v295_v12 = vadd.f32 %v940_v45, %v1444_v40 }
 0x131   :  { %v175_v50 = vadd.f32 %v899_v47, %v1444_v40  ;;  %v169_v51 = vpop.f32.mrb[3].mxu0  ;;  %v290_v0 = vadd.f32 %v1444_v40, %v289_v48 }
 0x132   :  { %v170_v52 = vadd.f32 %v1444_v40, %v169_v51  ;;  %1026 = vmatprep.mubr.f32.mxu0 %v198_v46  ;;  %v329_v15 = vmax.f32 %v295_v12, 0.0 }
 0x133   :  { %1027 = vmatmul.mubr.f32.vlgmr.msra.gmra.mrb[16].mxu0 %v199_v49  ;;  %v943_v53 = vpop.f32.mrb[2].mxu1  ;;  %v201_v57 = vmax.f32 %v175_v50, 0.0  ;;  %v328_v8 = vmax.f32 %v290_v0, 0.0 }
 0x134   :  { %v200_v54 = vmax.f32 %v170_v52, 0.0  ;;  %v902_v55 = vpop.f32.mrb[4].mxu0  ;;  %v299_v56 = vpop.f32.mrb[3].mxu1  ;;  %v305_v16 = vadd.f32 %v943_v53, %v1444_v40 }
 0x135   :  { %v185_v58 = vadd.f32 %v902_v55, %v1444_v40  ;;  %v179_v59 = vpop.f32.mrb[5].mxu0  ;;  %v300_v9 = vadd.f32 %v1444_v40, %v299_v56  ;;  %v1473_v56 = vld [vmem:[%s1518_s4] ss:$0 sm:$0xff]  ;;  %s1311_s4 = smov [#allocation8]  }
 0x136   :  { %v180_v60 = vadd.f32 %v1444_v40, %v179_v59  ;;  %1029 = vmatprep.mubr.f32.mxu0 %v200_v54  ;;  %v331_v19 = vmax.f32 %v305_v16, 0.0  ;;  %s735_s8 = sshll.u32 %s1311_s4, 4  ;;  %s736_s8 = int_to_ptr.vmem [resolvable:$true] %s735_s8 }
 0x137   :  { %1030 = vmatmul.mubr.f32.gmra.mrb[18].mxu0 %v201_v57  ;;  %v946_v61 = vpop.f32.mrb[4].mxu1  ;;  %v203_v2 = vmax.f32 %v185_v58, 0.0  ;;  %v330_v13 = vmax.f32 %v300_v9, 0.0  ;;  %s1278_s9 = scalar_lea.vmem %s736_s8, 1024  ;;  %p1283_p11 = scmp.lt.s32.totalorder %s736_s8, %s736_s8 }
 0x138   :  { %v202_v62 = vmax.f32 %v180_v60, 0.0  ;;  %v905_v63 = vpop.f32.mrb[6].mxu0  ;;  %v309_v1 = vpop.f32.mrb[5].mxu1  ;;  %v315_v21 = vadd.f32 %v946_v61, %v1444_v40  ;;  %p1279_p10 = scmp.ne.s32.totalorder %s736_s8, %s1278_s9  ;;  %p1284_p12 = scmp.lt.s32.totalorder %s1278_s9, %s1278_s9 }
 0x139   :  { %v195_v3 = vadd.f32 %v905_v63, %v1444_v40  ;;  %v189_v4 = vpop.f32.mrb[7].mxu0  ;;  %v310_v14 = vadd.f32 %v1444_v40, %v309_v1 }
 0x13a   :  { %v190_v5 = vadd.f32 %v1444_v40, %v189_v4  ;;  %1032 = vmatprep.mubr.f32.mxu1 %v202_v62  ;;  %v333_v23 = vmax.f32 %v315_v21, 0.0  ;;  %p1285_p13 = por %p1284_p12, %p1283_p11 }
 0x13b   :  { %1033 = vmatmul.mubr.f32.vlgmr.msra.gmra.mrb[8].mxu1 %v203_v2  ;;  %v949_v6 = vpop.f32.mrb[6].mxu1  ;;  %v205_v11 = vmax.f32 %v195_v3, 0.0  ;;  %v332_v17 = vmax.f32 %v310_v14, 0.0 }
 0x13c   :  { %v204_v7 = vmax.f32 %v190_v5, 0.0  ;;  %v319_v10 = vpop.f32.mrb[7].mxu1  ;;  %v325_v24 = vadd.f32 %v949_v6, %v1444_v40  ;;  %p1286_p0 = pnand %p1285_p13, %p1279_p10 }
 0x13d   :  { %v320_v18 = vadd.f32 %v1444_v40, %v319_v10 }
 0x13e   :  { %1035 = vmatprep.mubr.f32.mxu1 %v204_v7  ;;  %v335_v26 = vmax.f32 %v325_v24, 0.0 }
 0x13f   :  { %1036 = vmatmul.mubr.f32.gmra.mrb[10].mxu1 %v205_v11  ;;  %v334_v22 = vmax.f32 %v320_v18, 0.0 }
 0x140   :  { %1038 = vmatprep.mubr.f32.mxu1 %v328_v8 }
 0x143   :  { %1039 = vmatmul.mubr.f32.gmra.mrb[12].mxu1 %v329_v15 }
 0x144   :  { %1041 = vmatprep.mubr.f32.mxu1 %v330_v13 }
 0x147   :  { %1042 = vmatmul.mubr.f32.gmra.mrb[14].mxu1 %v331_v19 }
 0x148   :  { %1044 = vmatprep.mubr.f32.mxu1 %v332_v17 }
 0x14b   :  { %1045 = vmatmul.mubr.f32.gmra.mrb[16].mxu1 %v333_v23 }
 0x14c   :  { %v984_v25 = vpop.f32.mrb[8].mxu0  ;;  %1047 = vmatprep.mubr.f32.mxu1 %v334_v22 }
 0x14d   :  { %v425_v27 = vadd.f32 %v984_v25, %v1444_v40  ;;  %v419_v28 = vpop.f32.mrb[9].mxu0 }
 0x14e   :  { %v420_v29 = vadd.f32 %v1444_v40, %v419_v28 }
 0x14f   :  { %1048 = vmatmul.mubr.f32.gmra.mrb[18].mxu1 %v335_v26  ;;  %v459_v32 = vmax.f32 %v425_v27, 0.0 }
 0x150   :  { %v458_v30 = vmax.f32 %v420_v29, 0.0  ;;  %v987_v31 = vpop.f32.mrb[10].mxu0 }
 0x151   :  { %v435_v20 = vadd.f32 %v987_v31, %v1444_v40  ;;  %v429_v33 = vpop.f32.mrb[11].mxu0 }
 0x152   :  { %v430_v34 = vadd.f32 %v1444_v40, %v429_v33  ;;  %1050 = vmatprep.mubr.f32.mxu1 %v458_v30 }
 0x153   :  { %1051 = vmatmul.mubr.f32.gmra.mrb[20].mxu1 %v459_v32  ;;  %v461_v37 = vmax.f32 %v435_v20, 0.0 }
 0x154   :  { %v460_v35 = vmax.f32 %v430_v34, 0.0  ;;  %v990_v36 = vpop.f32.mrb[12].mxu0 }
 0x155   :  { %v445_v38 = vadd.f32 %v990_v36, %v1444_v40  ;;  %v439_v39 = vpop.f32.mrb[13].mxu0 }
 0x156   :  { %v440_v41 = vadd.f32 %v1444_v40, %v439_v39  ;;  %1053 = vmatprep.mubr.f32.mxu1 %v460_v35 }
 0x157   :  { %1054 = vmatmul.mubr.f32.gmra.mrb[22].mxu1 %v461_v37  ;;  %v463_v44 = vmax.f32 %v445_v38, 0.0 }
 0x158   :  { %v462_v42 = vmax.f32 %v440_v41, 0.0  ;;  %v993_v43 = vpop.f32.mrb[14].mxu0 }
 0x159   :  { %v455_v45 = vadd.f32 %v993_v43, %v1444_v40  ;;  %v449_v46 = vpop.f32.mrb[15].mxu0 }
 0x15a   :  { %v450_v47 = vadd.f32 %v1444_v40, %v449_v46  ;;  %1056 = vmatprep.mubr.f32.mxu1 %v462_v42 }
 0x15b   :  { %1057 = vmatmul.mubr.f32.gmra.mrb[24].mxu1 %v463_v44  ;;  %v465_v49 = vmax.f32 %v455_v45, 0.0 }
 0x15c   :  { %v464_v48 = vmax.f32 %v450_v47, 0.0 }
 0x15e   :  { %1059 = vmatprep.mubr.f32.mxu1 %v464_v48 }
 0x15f   :  { %1060 = vmatmul.mubr.f32.gmra.mrb[26].mxu1 %v465_v49 }
 0x206   :  { %v1028_v50 = vpop.f32.mrb[16].mxu0 }
 0x207   :  { %v555_v51 = vpop.f32.mrb[17].mxu0  ;;  %v561_v40 = vadd.f32 %v1028_v50, %v1473_v56 }
 0x208   :  { %v556_v59 = vadd.f32 %v1473_v56, %v555_v51 }
 0x209   :  { %v675_v0 = vmax.f32 %v561_v40, 0.0 }
 0x20a   :  { %v1031_v52 = vpop.f32.mrb[18].mxu0  ;;  %v674_v3 = vmax.f32 %v556_v59, 0.0 }
 0x20b   :  { %v565_v53 = vpop.f32.mrb[19].mxu0  ;;  %v571_v1 = vadd.f32 %v1031_v52, %v1473_v56 }
 0x20c   :  { %v566_v4 = vadd.f32 %v1473_v56, %v565_v53 }
 0x20d   :  { %v677_v12 = vmax.f32 %v571_v1, 0.0 }
 0x20e   :  { %v1034_v54 = vpop.f32.mrb[8].mxu1  ;;  %v676_v15 = vmax.f32 %v566_v4, 0.0 }
 0x20f   :  { %v575_v55 = vpop.f32.mrb[9].mxu1  ;;  %v581_v13 = vadd.f32 %v1034_v54, %v1473_v56 }
 0x210   :  { %v576_v16 = vadd.f32 %v1473_v56, %v575_v55 }
 0x211   :  { %v679_v25 = vmax.f32 %v581_v13, 0.0 }
 0x212   :  { %v1037_v57 = vpop.f32.mrb[10].mxu1  ;;  %v678_v28 = vmax.f32 %v576_v16, 0.0 }
 0x213   :  { %v585_v58 = vpop.f32.mrb[11].mxu1  ;;  %v591_v26 = vadd.f32 %v1037_v57, %v1473_v56 }
 0x214   :  { %v586_v29 = vadd.f32 %v1473_v56, %v585_v58 }
 0x215   :  { %v681_v36 = vmax.f32 %v591_v26, 0.0 }
 0x216   :  { %v1040_v60 = vpop.f32.mrb[12].mxu1  ;;  %v680_v38 = vmax.f32 %v586_v29, 0.0 }
 0x217   :  { %v601_v61 = vadd.f32 %v1040_v60, %v1473_v56  ;;  %v595_v62 = vpop.f32.mrb[13].mxu1 }
 0x218   :  { %v596_v63 = vadd.f32 %v1473_v56, %v595_v62 }
 0x219   :  { %v683_v2 = vmax.f32 %v601_v61, 0.0 }
 0x21a   :  { %v682_v5 = vmax.f32 %v596_v63, 0.0  ;;  %v1043_v6 = vpop.f32.mrb[14].mxu1 }
 0x21b   :  { %v700_v7 = vadd.f32 %v683_v2, %v675_v0  ;;  %v611_v8 = vadd.f32 %v1043_v6, %v1473_v56  ;;  %v605_v9 = vpop.f32.mrb[15].mxu1 }
 0x21c   :  { %v698_v10 = vadd.f32 %v682_v5, %v674_v3  ;;  %v606_v11 = vadd.f32 %v1473_v56, %v605_v9 }
 0x21d   :  { %v685_v14 = vmax.f32 %v611_v8, 0.0 }
 0x21e   :  { %v684_v17 = vmax.f32 %v606_v11, 0.0  ;;  %v1046_v18 = vpop.f32.mrb[16].mxu1 }
 0x21f   :  { %v704_v19 = vadd.f32 %v685_v14, %v677_v12  ;;  %v621_v21 = vadd.f32 %v1046_v18, %v1473_v56  ;;  %v615_v22 = vpop.f32.mrb[17].mxu1 }
 0x220   :  { %v702_v23 = vadd.f32 %v684_v17, %v676_v15  ;;  %v616_v24 = vadd.f32 %v1473_v56, %v615_v22 }
 0x221   :  { %v687_v27 = vmax.f32 %v621_v21, 0.0 }
 0x222   :  { %v686_v30 = vmax.f32 %v616_v24, 0.0  ;;  %v1049_v31 = vpop.f32.mrb[18].mxu1 }
 0x223   :  { %v708_v32 = vadd.f32 %v687_v27, %v679_v25  ;;  %v631_v20 = vadd.f32 %v1049_v31, %v1473_v56  ;;  %v625_v33 = vpop.f32.mrb[19].mxu1 }
 0x224   :  { %v706_v34 = vadd.f32 %v686_v30, %v678_v28  ;;  %v626_v35 = vadd.f32 %v1473_v56, %v625_v33 }
 0x225   :  { %v689_v37 = vmax.f32 %v631_v20, 0.0 }
 0x226   :  { %v688_v39 = vmax.f32 %v626_v35, 0.0  ;;  %v1052_v41 = vpop.f32.mrb[20].mxu1 }
 0x227   :  { %v712_v42 = vadd.f32 %v689_v37, %v681_v36  ;;  %v641_v43 = vadd.f32 %v1052_v41, %v1473_v56  ;;  %v635_v44 = vpop.f32.mrb[21].mxu1 }
 0x228   :  { %v710_v45 = vadd.f32 %v688_v39, %v680_v38  ;;  %v636_v46 = vadd.f32 %v1473_v56, %v635_v44 }
 0x229   :  { %v691_v47 = vmax.f32 %v641_v43, 0.0 }
 0x22a   :  { %v690_v48 = vmax.f32 %v636_v46, 0.0  ;;  %v1055_v49 = vpop.f32.mrb[22].mxu1 }
 0x22b   :  { %v701_v50 = vadd.f32 %v700_v7, %v691_v47  ;;  %v651_v51 = vadd.f32 %v1055_v49, %v1473_v56  ;;  %v645_v52 = vpop.f32.mrb[23].mxu1 }
 0x22c   :  { %v699_v53 = vadd.f32 %v698_v10, %v690_v48  ;;  %v646_v54 = vadd.f32 %v1473_v56, %v645_v52 }
 0x22d   :  { %v715_v55 = vmul.f32 0.33333334, %v701_v50  ;;  %v693_v57 = vmax.f32 %v651_v51, 0.0 }
 0x22e   :  { %v714_v58 = vmul.f32 0.33333334, %v699_v53  ;;  %v692_v40 = vmax.f32 %v646_v54, 0.0  ;;  %v1058_v59 = vpop.f32.mrb[24].mxu1 }
 0x22f   :  { %723 = vst [vmem:[#allocation8 + $0x8] sm:$0xff] %v715_v55  ;;  %v705_v60 = vadd.f32 %v704_v19, %v693_v57  ;;  %v661_v61 = vadd.f32 %v1058_v59, %v1473_v56  ;;  %v655_v62 = vpop.f32.mrb[25].mxu1 }
 0x230   :  { %722 = vst [vmem:[#allocation8] sm:$0xff] %v714_v58  ;;  %v703_v63 = vadd.f32 %v702_v23, %v692_v40  ;;  %v656_v0 = vadd.f32 %v1473_v56, %v655_v62 }
 0x231   :  { %v717_v1 = vmul.f32 0.33333334, %v705_v60  ;;  %v695_v2 = vmax.f32 %v661_v61, 0.0 }
 0x232   :  { %v716_v3 = vmul.f32 0.33333334, %v703_v63  ;;  %v694_v4 = vmax.f32 %v656_v0, 0.0  ;;  %v1061_v5 = vpop.f32.mrb[26].mxu1 }
 0x233   :  { %725 = vst [vmem:[#allocation8 + $0x18] sm:$0xff] %v717_v1  ;;  %v709_v6 = vadd.f32 %v708_v32, %v695_v2  ;;  %v671_v7 = vadd.f32 %v1061_v5, %v1473_v56  ;;  %v665_v8 = vpop.f32.mrb[27].mxu1 }
 0x234   :  { %724 = vst [vmem:[#allocation8 + $0x10] sm:$0xff] %v716_v3  ;;  %v707_v9 = vadd.f32 %v706_v34, %v694_v4  ;;  %v666_v10 = vadd.f32 %v1473_v56, %v665_v8 }
 0x235   :  { %v719_v11 = vmul.f32 0.33333334, %v709_v6  ;;  %v697_v12 = vmax.f32 %v671_v7, 0.0 }
 0x236   :  { %v718_v13 = vmul.f32 0.33333334, %v707_v9  ;;  %v696_v14 = vmax.f32 %v666_v10, 0.0 }
 0x237   :  { %727 = vst [vmem:[#allocation8 + $0x28] sm:$0xff] %v719_v11  ;;  %v713_v15 = vadd.f32 %v712_v42, %v697_v12 }
 0x238   :  { %726 = vst [vmem:[#allocation8 + $0x20] sm:$0xff] %v718_v13  ;;  %v711_v16 = vadd.f32 %v710_v45, %v696_v14 }
 0x239   :  { %v721_v17 = vmul.f32 0.33333334, %v713_v15 }
 0x23a   :  { %v720_v18 = vmul.f32 0.33333334, %v711_v16 }
 0x23b   :  { %729 = vst [vmem:[#allocation8 + $0x38] sm:$0xff] %v721_v17 }
 0x23c   :  { %728 = vst [vmem:[#allocation8 + $0x30] sm:$0xff] %v720_v18 }
 0x23d   :  { %1289 = shalt.err (!%p1286_p0)
}
 0x23e   :  { %s1290_s12 = scalar_lea.hbm %s1519_s5, 1024 }
 0x23f   :  { %p1291_p1 = scmp.ne.s32.totalorder %s1519_s5, %s1290_s12  ;;  %p1294_p2 = scmp.lt.u32.totalorder %s1290_s12, %s1519_s5 }
 0x241   :  { %p1296_p3 = pnand %p1294_p2, %p1291_p1 }
 0x243   :  { %1299 = shalt.err (!%p1296_p3)
}
 0x244   :  { %741 = dma.vmem_to_hbm [thread:$0]  %s736_s8, 1024, %s1519_s5, [#allocation4], %s1308_s30, %s1308_s30, %s1309_s6  }
 0x245   :  { %1304 = dma.done.wait [#allocation4], 1024  }
 0x246   :  { %1305 = vsyncadd [#allocation4], 4294966272 }
 0x247   :  { %745 = vsyncpa [#allocation3], 1 }
 0x248   :  { %746 = vsyncpa [#allocation6], 1 }
 0x249   :  { %747 = vsyncpa [#allocation4], 1 }

</bundles_post_ra>
